<compile_context>
chip_gen: v7x
topology: tpu7x:2x2x1
jax: 0.10.0
libtpu: 0.0.40
codegen_flags: <defaults>
</compile_context>

<pallas_src>
import functools

import jax
import jax.numpy as jnp
from jax.experimental import pallas as pl
from jax.experimental.pallas import tpu as pltpu


def _phong_normal_kernel(pix_ref, fnt_ref, out_ref):
    # pix_ref : (1, TP)      int32   -- pix_to_face for this tile (lane-dense)
    # fnt_ref : (3, F_pad)   float32 -- transposed per-face summed vertex normals
    # out_ref : (3, TP)      float32 -- pixel normals, channels on sublanes
    pix = pix_ref[...]                                              # (1, TP)
    f_pad = fnt_ref.shape[1]
    tp = pix.shape[1]

    # One-hot over faces: column is all-zero for background (-1) or any
    # out-of-range value (e.g. stale data in the ragged tail block).
    face_iota = jax.lax.broadcasted_iota(jnp.int32, (f_pad, tp), 0)
    onehot = (face_iota == pix).astype(jnp.float32)                 # (F_pad, TP)

    # Gather (and implicit vertex-sum, already folded into fnt) on the MXU.
    gathered = jnp.dot(fnt_ref[...], onehot,
                       preferred_element_type=jnp.float32)          # (3, TP)

    # Explicit background mask (matches interpolate_face_attributes); cheap.
    out_ref[...] = jnp.where(pix < 0, 0.0, gathered)


def _round_up(x, m):
    return (x + m - 1) // m * m


@functools.partial(jax.jit, static_argnames=("tile_p_max",))
def hard_phong_normal_shader(pix_to_face, bary_coords, faces, verts_normals,
                             *, tile_p_max=2048):
    """Returns pixel normals of shape (N, H, W, K, 3), float32.

    `bary_coords` is accepted for API parity with the PyTorch module but is
    unused: the module replaces it with ones before interpolation.
    """
    del bary_coords  # replaced by ones in the module -> folded into fn_sum
    n, h, w, k = pix_to_face.shape
    num_faces = faces.shape[0]

    # Ones-weights => plain sum over the 3 vertex normals; fold into the table
    # once, transposed so faces sit on the (padded) 128-lane axis.
    fn_sum = verts_normals[faces].sum(axis=1).astype(jnp.float32)      # (F, 3)
    f_pad = _round_up(max(num_faces, 1), 128)
    fn_t = jnp.zeros((3, f_pad), jnp.float32).at[:, :num_faces].set(fn_sum.T)

    p = n * h * w * k
    pix = pix_to_face.reshape(1, p).astype(jnp.int32)                  # lane-dense

    # Lane-dense pixel tile: multiple of 128, aim for >= ~8 grid steps (keeps
    # both TensorCores busy on v7x), capped so the (F_pad, tile_p) one-hot
    # intermediate stays small in VMEM (v7x: 64 MiB phys / 32 MiB scoped;
    # v5e: 16 MiB default scoped).
    tile_p = max(128, min(tile_p_max, _round_up(max(p // 8, 1), 128)))
    grid = pl.cdiv(p, tile_p)   # ragged last block: OOB reads ignored via the
                                # one-hot compare, OOB output columns dropped.

    out = pl.pallas_call(
        _phong_normal_kernel,
        out_shape=jax.ShapeDtypeStruct((3, p), jnp.float32),
        grid_spec=pltpu.PrefetchScalarGridSpec(
            num_scalar_prefetch=0,
            grid=(grid,),
            in_specs=[
                pl.BlockSpec((1, tile_p), lambda i: (0, i)),
                pl.BlockSpec((3, f_pad), lambda i: (0, 0)),   # resident each step
            ],
            out_specs=pl.BlockSpec((3, tile_p), lambda i: (0, i)),
        ),
        compiler_params=pltpu.CompilerParams(
            dimension_semantics=("parallel",)),
    )(pix, fn_t)

    # (3, P) -> (P, 3) -> (N, H, W, K, 3); cheap layout pass in the wrapper.
    return out.T.reshape(n, h, w, k, 3)


def _reference(pix_to_face, bary_coords, faces, verts_normals):
    """Pure-JAX reference matching pytorch3d interpolate_face_attributes with ones."""
    faces_normals = verts_normals[faces]                      # (F, 3, 3)
    ones = jnp.ones_like(bary_coords, dtype=jnp.float32)      # (N, H, W, K, 3)
    idx = jnp.maximum(pix_to_face, 0)
    vals = faces_normals[idx]                                 # (N, H, W, K, 3, 3)
    out = (ones[..., None] * vals).sum(axis=-2)               # (N, H, W, K, 3)
    mask = (pix_to_face < 0)[..., None]
    return jnp.where(mask, 0.0, out)


if __name__ == "__main__":
    key = jax.random.PRNGKey(0)
    k_faces, k_norm, k_pix, k_bary = jax.random.split(key, 4)

    # Synthetic mesh (deterministic, in-script): V vertices, F triangular faces.
    V, F = 24, 36
    faces = jax.random.randint(k_faces, (F, 3), 0, V, dtype=jnp.int32)
    verts_normals = jax.random.normal(k_norm, (V, 3), dtype=jnp.float32)
    verts_normals = verts_normals / jnp.linalg.norm(verts_normals, axis=-1,
                                                    keepdims=True)

    # Synthetic fragments: N=2, H=W=16, K=2 faces per pixel; -1 marks background.
    N, H, W, K = 2, 16, 16, 2
    pix_to_face = jax.random.randint(k_pix, (N, H, W, K), -1, F, dtype=jnp.int32)
    bary_raw = jax.random.uniform(k_bary, (N, H, W, K, 3), dtype=jnp.float32) + 1e-3
    bary_coords = bary_raw / bary_raw.sum(axis=-1, keepdims=True)

    # TODO(synk): the PyTorch module also validates `cameras is not None`
    # (pure control-flow / container plumbing, no numeric Pallas equivalent).

    result = hard_phong_normal_shader(pix_to_face, bary_coords, faces, verts_normals)
    result = jax.block_until_ready(result)

    expected = _reference(pix_to_face, bary_coords, faces, verts_normals)
    assert result.shape == (N, H, W, K, 3), result.shape
    assert jnp.allclose(result, expected, atol=1e-5, rtol=1e-5), (
        float(jnp.max(jnp.abs(result - expected))))

    print("KERNEL_OK")
</pallas_src>

<mosaic_0001>
module attributes {stable_mosaic.version = 11 : i64} {
  func.func @_phong_normal_kernel(%arg0: i32, %arg1: memref<1x128xi32, #tpu.memory_space<vmem>>, %arg2: memref<3x128xf32, #tpu.memory_space<vmem>>, %arg3: memref<3x128xf32, #tpu.memory_space<vmem>>) attributes {dimension_semantics = [#tpu.dimension_semantics<parallel>], iteration_bounds = array<i64: 8>, scalar_prefetch = 0 : i64, scratch_operands = 0 : i64, tpu.core_type = #tpu.core_type<tc>, window_params = [{transform_indices = @transform_0, window_bounds = array<i64: 1, 128>}, {pipeline_mode = #tpu.pipeline_mode<synchronous>, transform_indices = @transform_1, window_bounds = array<i64: 3, 128>}, {transform_indices = @transform_2, window_bounds = array<i64: 3, 128>}]} {
    %c0 = arith.constant 0 : index
    %c0_0 = arith.constant 0 : index
    %0 = vector.load %arg1[%c0, %c0_0] : memref<1x128xi32, #tpu.memory_space<vmem>>, vector<1x128xi32>
    %1 = tpu.iota {dimensions = array<i32: 0>} : vector<128x128xi32>
    %2 = vector.broadcast %0 : vector<1x128xi32> to vector<128x128xi32>
    %3 = arith.cmpi eq, %1, %2 : vector<128x128xi32>
    %4 = arith.extui %3 : vector<128x128xi1> to vector<128x128xi32>
    %5 = arith.sitofp %4 : vector<128x128xi32> to vector<128x128xf32>
    %c0_1 = arith.constant 0 : index
    %c0_2 = arith.constant 0 : index
    %6 = vector.load %arg2[%c0_1, %c0_2] : memref<3x128xf32, #tpu.memory_space<vmem>>, vector<3x128xf32>
    %cst = arith.constant dense<0.000000e+00> : vector<3x128xf32>
    %7 = tpu.matmul %6, %5, %cst {dimension_numbers = #tpu.dot_dimension_numbers<[1], [0], [0], [1], [0, 0, 1, 1], [], []>} : vector<3x128xf32>, vector<128x128xf32>, vector<3x128xf32> -> vector<3x128xf32>
    %c0_i32 = arith.constant 0 : i32
    %8 = vector.broadcast %c0_i32 : i32 to vector<1x128xi32>
    %9 = arith.cmpi slt, %0, %8 : vector<1x128xi32>
    %cst_3 = arith.constant 0.000000e+00 : f32
    %10 = vector.shape_cast %9 : vector<1x128xi1> to vector<1x128xi1>
    %11 = vector.broadcast %10 : vector<1x128xi1> to vector<3x128xi1>
    %12 = vector.broadcast %cst_3 : f32 to vector<3x128xf32>
    %13 = arith.select %11, %12, %7 : vector<3x128xi1>, vector<3x128xf32>
    %c0_4 = arith.constant 0 : index
    %c0_5 = arith.constant 0 : index
    %14 = vector.load %arg3[%c0_4, %c0_5] : memref<3x128xf32, #tpu.memory_space<vmem>>, vector<3x128xf32>
    tpu.vector_store %arg3[%c0_4, %c0_5], %13 {strides = array<i32>} : memref<3x128xf32, #tpu.memory_space<vmem>>, vector<3x128xf32>,
    return
  }
  func.func @transform_0(%arg0: i32) -> (i32, i32) {
    %c0_i32 = arith.constant 0 : i32
    %c0_i32_0 = arith.constant 0 : i32
    return %c0_i32, %arg0 : i32, i32
  }
  func.func @transform_1(%arg0: i32) -> (i32, i32) {
    %c0_i32 = arith.constant 0 : i32
    %c0_i32_0 = arith.constant 0 : i32
    %c0_i32_1 = arith.constant 0 : i32
    return %c0_i32, %c0_i32_0 : i32, i32
  }
  func.func @transform_2(%arg0: i32) -> (i32, i32) {
    %c0_i32 = arith.constant 0 : i32
    %c0_i32_0 = arith.constant 0 : i32
    return %c0_i32, %arg0 : i32, i32
  }
}

</mosaic_0001>

<bundles_post_ra>
// kernel: hard_phong_normal_shader.1
= control target key start
LH: loop header
LB: loop body
LE: loop exit
PB: predicated region body
PF: predicated region fallthrough
CT: control target
= control target key end

     0   :  { %s493_s9 = smov 0   ;;  %s544_s0 = inlined_call_operand.vmem [shape: s32[1,1024], index: 0, kind: input, shape index: {}]   ;;  %s545_s1 = inlined_call_operand.vmem [shape: f32[3,128], index: 1, kind: input, shape index: {}]   ;;  %s546_s2 = inlined_call_operand.vmem [shape: f32[3,1024], index: 2, kind: output, shape index: {}]  }
   0x1 LB: > { %s336_s10 = sadd.s32 4294967295, %s471_s9   ;;  %p340_p0 = scmp.ge.s32.totalorder %s471_s9, 1  ;;  %s471_s9 = sphi %s493_s9, %s12_s9  }
   0x2   : > { %p110_p1 = scmp.lt.s32.totalorder %s471_s9, 9 }
   0x4   : > { %p111_p2 = pnand %p340_p0, %p110_p1 }
   0x5   : > { %p129_p3 = scmp.lt.s32.totalorder (!%p111_p2), %s336_s10, 7  ;;  %v137_v0 = vlaneseq (!%p111_p2)  ;;  %v473_v1 = vmov (!%p111_p2), 0.0|0.0   ;;  %vm474_vm0 = vmmov (!%p111_p2), 0   ;;  %v475_v3 = vmov (!%p111_p2), 0.0   ;;  %v206_v23 = vld [vmem:[%s545_s1] sm:$0x7] (!%p111_p2) }
   0x6   : > { %114 = sbr.rel (%p111_p2) target bundleno = 265 (0x109), region = 28  ;;  %428 = vmatprep.subr.bf16.mxu0 (!%p111_p2), %v473_v1  ;;  %425 = vmatprep.mubr.msk.f32.mxu0 (!%p111_p2), %vm474_vm0, %v475_v3  ;;  %v476_v12 = vmov (!%p111_p2), 1.0|1.0   ;;  %v477_v24 = vmov (!%p111_p2), 0  }
   0x7   : > { %v504_v2 = vshrl.u32 (!%p111_p2), %v137_v0, 7 }
   0x9   : > { %v139_v4 = vadd.s32 (!%p111_p2), 8, %v504_v2  ;;  %v156_v5 = vsub.s32 (!%p111_p2), 0, %v504_v2  ;;  %v140_v6 = vadd.s32 (!%p111_p2), 16, %v504_v2  ;;  %v141_v7 = vadd.s32 (!%p111_p2), 24, %v504_v2 }
   0xa   : > { %v142_v10 = vadd.s32 (!%p111_p2), 32, %v504_v2  ;;  %v143_v11 = vadd.s32 (!%p111_p2), 40, %v504_v2  ;;  %v144_v13 = vadd.s32 (!%p111_p2), 48, %v504_v2  ;;  %v145_v14 = vadd.s32 (!%p111_p2), 56, %v504_v2 }
   0xb   : > { %v146_v15 = vadd.s32 (!%p111_p2), 64, %v504_v2  ;;  %v147_v16 = vadd.s32 (!%p111_p2), 72, %v504_v2  ;;  %v148_v17 = vadd.s32 (!%p111_p2), 80, %v504_v2  ;;  %v149_v18 = vadd.s32 (!%p111_p2), 88, %v504_v2 }
   0xc   : > { %v150_v19 = vadd.s32 (!%p111_p2), 96, %v504_v2  ;;  %v151_v20 = vadd.s32 (!%p111_p2), 104, %v504_v2  ;;  %v152_v21 = vadd.s32 (!%p111_p2), 112, %v504_v2  ;;  %v153_v22 = vadd.s32 (!%p111_p2), 120, %v504_v2 }
   0xd   : > { %s548_s10 = smov (!%p129_p3, %s336_s10), 7 }
   0xe   : > { %s131_s13 = scalar_lea.vmem %s544_s0, %s548_s10  ;;  %s341_s16 = sshll.u32 %s548_s10, 2 }
   0xf   : > { %v136_v8 = vld [vmem:[%s131_s13] sm:$0x1]  ;;  %s135_s19 = scalar_lea.vmem %s546_s2, %s341_s16 }
  0x10   : > { %v157_v9 = vrot.slane %v136_v8, %v156_v5 }
  0x12   : > { %vm158_vm1 = vcmp.eq.s32.totalorder %v504_v2, %v157_v9  ;;  %vm159_vm2 = vcmp.eq.s32.totalorder %v139_v4, %v157_v9  ;;  %vm160_vm3 = vcmp.eq.s32.totalorder %v140_v6, %v157_v9  ;;  %vm161_vm4 = vcmp.eq.s32.totalorder %v141_v7, %v157_v9 }
  0x13   : > { %vm429_vm5 = vmpackc.low %vm159_vm2, %vm158_vm1  ;;  %vm162_vm7 = vcmp.eq.s32.totalorder %v142_v10, %v157_v9  ;;  %vm163_vm8 = vcmp.eq.s32.totalorder %v143_v11, %v157_v9  ;;  %vm164_vm10 = vcmp.eq.s32.totalorder %v144_v13, %v157_v9  ;;  %vm165_vm11 = vcmp.eq.s32.totalorder %v145_v14, %v157_v9 }
  0x14   : > { %430 = vmatpush3.bf16.msk.msra.mxu0 %vm429_vm5, %v476_v12  ;;  %vm432_vm6 = vmpackc.low %vm161_vm4, %vm160_vm3  ;;  %vm166_vm13 = vcmp.eq.s32.totalorder %v146_v15, %v157_v9  ;;  %vm167_vm14 = vcmp.eq.s32.totalorder %v147_v16, %v157_v9  ;;  %vm168_vm0 = vcmp.eq.s32.totalorder %v148_v17, %v157_v9  ;;  %vm169_vm1 = vcmp.eq.s32.totalorder %v149_v18, %v157_v9 }
  0x15   : > { %431 = vmatprep.subr.bf16.mxu0 %v473_v1  ;;  %vm435_vm9 = vmpackc.low %vm163_vm8, %vm162_vm7  ;;  %vm170_vm3 = vcmp.eq.s32.totalorder %v150_v19, %v157_v9  ;;  %vm171_vm4 = vcmp.eq.s32.totalorder %v151_v20, %v157_v9  ;;  %vm173_vm7 = vcmp.eq.s32.totalorder %v153_v22, %v157_v9 }
  0x16   : > { %vm438_vm12 = vmpackc.low %vm165_vm11, %vm164_vm10 }
  0x17   : > { %vm441_vm15 = vmpackc.low %vm167_vm14, %vm166_vm13 }
  0x18   : > { %433 = vmatpush3.bf16.msk.msra.mxu0 %vm432_vm6, %v476_v12  ;;  %vm444_vm2 = vmpackc.low %vm169_vm1, %vm168_vm0  ;;  %vm172_vm6 = vcmp.eq.s32.totalorder %v152_v21, %v157_v9 }
  0x19   : > { %434 = vmatprep.subr.bf16.mxu0 %v473_v1  ;;  %vm447_vm5 = vmpackc.low %vm171_vm4, %vm170_vm3 }
  0x1a   : > { %vm450_vm8 = vmpackc.low %vm173_vm7, %vm172_vm6 }
  0x1c   : > { %436 = vmatpush3.bf16.msk.msra.mxu0 %vm435_vm9, %v476_v12  ;;  %vm277_vm9 = vcmp.lt.s32.totalorder %v136_v8, 0 }
  0x1d   : > { %437 = vmatprep.subr.bf16.mxu0 %v473_v1  ;;  %v278_v25 = vsel %vm277_vm9, 1, %v477_v24 }
  0x1e   : > { %v282_v26 = vrot.slane %v278_v25, %v156_v5 }
  0x20   : > { %439 = vmatpush3.bf16.msk.msra.mxu0 %vm438_vm12, %v476_v12  ;;  %vm283_vm10 = vcmp.eq.s32.totalorder %v282_v26, 1 }
  0x21   : > { %440 = vmatprep.subr.bf16.mxu0 %v473_v1 }
  0x24   : > { %442 = vmatpush3.bf16.msk.msra.mxu0 %vm441_vm15, %v476_v12 }
  0x25   : > { %443 = vmatprep.subr.bf16.mxu0 %v473_v1 }
  0x28   : > { %445 = vmatpush3.bf16.msk.msra.mxu0 %vm444_vm2, %v476_v12 }
  0x29   : > { %446 = vmatprep.subr.bf16.mxu0 %v473_v1 }
  0x2c   : > { %448 = vmatpush3.bf16.msk.msra.mxu0 %vm447_vm5, %v476_v12 }
  0x2d   : > { %449 = vmatprep.subr.bf16.mxu0 %v473_v1 }
  0x30   : > { %451 = vmatpush3.bf16.msk.msra.mxu0 %vm450_vm8, %v476_v12 }
  0x33   : > { %426 = vmatmul.mubr.f32.vlgmr.msra.gmra.mrb[0].mxu0 %v206_v23 }
 0x106   : > { %v273_v27 = vpop.f32.mrb[0].mxu0 }
 0x107   : > { %v284_v28 = vsel %vm283_vm10, 0.0, %v273_v27  ;;  %v427_v29 = vpop.f32.mrb[1].mxu0 }
 0x108   : > { %285 = vst [vmem:[%s135_s19] sm:$0x7] %v284_v28 }
 0x109 PF: > { %s12_s9 = sadd.s32 1, %s471_s9  }
 0x10a   : > { %p9_p4 = scmp.ge.s32.totalorder %s12_s9, 10  }
 0x10c   :  { %11 = sbr.rel (!%p9_p4) target bundleno = 1 (0x1), region = 58 }

</bundles_post_ra>
